<compile_context>
chip_gen: v7x
topology: tpu7x:2x2x1
jax: 0.10.0
libtpu: 0.0.40
codegen_flags: <defaults>
</compile_context>

<pallas_src>
import functools

import jax
import jax.numpy as jnp
from jax.experimental import pallas as pl
from jax.experimental.pallas import tpu as pltpu


# ---------------------------------------------------------------------------
# Fused single-pass kernel: pool -> excite -> scale on a resident slab.
# ---------------------------------------------------------------------------
def _fused_kernel(x_ref, w1_ref, b1_ref, w2_ref, b2_ref, o_ref, *, inv_hw):
    # x_ref / o_ref: (NB, C, HW) in the activation dtype.
    # w1: (Cr, C) f32, b1: (Cr, 1) f32, w2: (C, Cr) f32, b2: (C, 1) f32.
    nb, _, hw = x_ref.shape
    dtype = o_ref.dtype

    # Hoisted: ones column for the MXU dot-with-ones reduction and the weights.
    ones = jnp.ones((hw, 1), dtype=x_ref.dtype)
    w1 = w1_ref[...]
    b1 = b1_ref[...]
    w2 = w2_ref[...]
    b2 = b2_ref[...]

    # Unrolled over the (small) per-step sample group: everything stays 2-D,
    # no in-kernel relayouts/reshapes.
    for b in range(nb):
        x = x_ref[b]                                                   # (C, HW)
        # MXU dot-with-ones: f32-accumulated spatial sum without materializing
        # an f32 copy of the slab and without an XLU whole-row reduction.
        pooled = jnp.dot(x, ones, preferred_element_type=jnp.float32) * inv_hw  # (C, 1)
        h = jnp.dot(w1, pooled, preferred_element_type=jnp.float32) + b1        # (Cr, 1)
        h = jnp.maximum(h, 0.0)
        z = jnp.dot(w2, h, preferred_element_type=jnp.float32) + b2             # (C, 1)
        s = jax.nn.sigmoid(z)                                                   # (C, 1)
        o_ref[b] = x * s.astype(dtype)                                 # (C, HW)


# ---------------------------------------------------------------------------
# Fallback pass 1: global spatial sum over a tiled HW axis (no HBM padding;
# the tail tile is masked in-kernel since OOB block contents are undefined).
# ---------------------------------------------------------------------------
def _pool_kernel(x_ref, sum_ref, *, hw, tile):
    # x_ref: (C, T) native dtype; sum_ref: (C, 1) f32, resident across HW tiles.
    t = pl.program_id(1)
    x = x_ref[...]
    if hw % tile != 0:
        col = jax.lax.broadcasted_iota(jnp.int32, x.shape, x.ndim - 1)
        x = jnp.where(t * tile + col < hw, x, jnp.zeros_like(x))
    ones = jnp.ones((x.shape[-1], 1), dtype=x.dtype)
    part = jnp.dot(x, ones, preferred_element_type=jnp.float32)        # (C, 1)

    @pl.when(t == 0)
    def _():
        sum_ref[...] = part

    @pl.when(t != 0)
    def _():
        sum_ref[...] = sum_ref[...] + part


# ---------------------------------------------------------------------------
# Fallback pass 3: per-channel scaling (pure streaming, lane-dense stores).
# ---------------------------------------------------------------------------
def _scale_kernel(x_ref, s_ref, o_ref):
    # x_ref: (C, T); s_ref: (C, 1) already in the activation dtype; o_ref: (C, T).
    # Partial tail blocks are handled by Pallas' masked stores.
    o_ref[...] = x_ref[...] * s_ref[...]


# ---------------------------------------------------------------------------
# Sizing helpers.
# ---------------------------------------------------------------------------
def _vmem_capacity_bytes():
    """Physical VMEM per TensorCore; v7x-safe default if the query fails."""
    try:
        cap = int(getattr(pltpu.get_tpu_info(), "vmem_capacity_bytes", 0))
        if cap > 0:
            return cap
    except Exception:
        pass
    return 64 * 1024 * 1024  # v7x has 64 MiB/TC (v5e/v6e have 128 MiB)


def _largest_divisor_leq(n, cap):
    cap = max(1, min(n, cap))
    for d in range(cap, 0, -1):
        if n % d == 0:
            return d
    return 1


def _choose_hw_tile(hw, c, itemsize, max_block_bytes):
    """Largest lane tile (multiple of 128) with one block <= max_block_bytes."""
    hw128 = pl.cdiv(hw, 128) * 128
    by_vmem = max(128, (max_block_bytes // max(1, c * itemsize)) // 128 * 128)
    return int(min(hw128, by_vmem))


# ---------------------------------------------------------------------------
# Wrapper.
# ---------------------------------------------------------------------------
def se_module(x_nchw, w1, b1, w2, b2, *, force_multi_pass=False):
    """x_nchw: (N, C, H, W); w1: (Cr, C); b1: (Cr,); w2: (C, Cr); b2: (C,)."""
    N, C, H, W = x_nchw.shape
    Cr = w1.shape[0]
    HW = H * W
    dtype = x_nchw.dtype
    itemsize = jnp.dtype(dtype).itemsize

    x_flat = x_nchw.reshape(N, C, HW)

    # --- per-generation VMEM budget (v7x: 64 MiB/TC; v5e/v6e: 128 MiB) ------
    cap = _vmem_capacity_bytes()
    vmem_limit = int(max(32 << 20, min(cap - (16 << 20), 96 << 20)))
    fused_budget = int(0.8 * vmem_limit)

    w1f = w1.astype(jnp.float32)                       # (Cr, C)
    w2f = w2.astype(jnp.float32)                       # (C, Cr)
    b1c = b1.astype(jnp.float32).reshape(Cr, 1)
    b2c = b2.astype(jnp.float32).reshape(C, 1)
    weight_bytes = 4 * (2 * C * Cr + C + Cr)

    slab = C * HW * itemsize                           # one sample, in OR out
    # Double-buffered input + output blocks (NB samples each) + weights.
    fused_ok = (not force_multi_pass) and (4 * slab + weight_bytes <= fused_budget)

    # ---------------- primary fused path -----------------------------------
    if fused_ok:
        nb_vmem = max(1, (fused_budget - weight_bytes) // (4 * slab))
        nb_size = max(1, (8 << 20) // slab)            # ~8 MiB blocks are plenty
        NB = _largest_divisor_leq(N, min(nb_vmem, nb_size))

        def wspec(shape):
            return pl.BlockSpec(shape, lambda g: (0, 0))

        out_flat = pl.pallas_call(
            functools.partial(_fused_kernel, inv_hw=1.0 / HW),
            out_shape=jax.ShapeDtypeStruct((N, C, HW), dtype),
            grid_spec=pltpu.PrefetchScalarGridSpec(
                num_scalar_prefetch=0,
                grid=(N // NB,),
                in_specs=[
                    pl.BlockSpec((NB, C, HW), lambda g: (g, 0, 0)),
                    wspec((Cr, C)),
                    wspec((Cr, 1)),
                    wspec((C, Cr)),
                    wspec((C, 1)),
                ],
                out_specs=pl.BlockSpec((NB, C, HW), lambda g: (g, 0, 0)),
            ),
            compiler_params=pltpu.CompilerParams(
                dimension_semantics=("parallel",),
                vmem_limit_bytes=vmem_limit,
            ),
            cost_estimate=pl.CostEstimate(
                flops=3 * N * C * HW + 4 * N * C * Cr,
                transcendentals=N * C,
                bytes_accessed=2 * N * C * HW * itemsize + weight_bytes,
            ),
        )(x_flat, w1f, b1c, w2f, b2c)
        return out_flat.reshape(N, C, H, W)

    # ---------------- fallback: 3-pass streaming path -----------------------
    # (Per-sample slab does not fit VMEM.)  Remaining known gap: on v7x with
    # batch 1, pass 1 could split the HW-tile axis into a second "parallel"
    # sub-axis with partial sums to feed both TensorCores.
    T = _choose_hw_tile(HW, C, itemsize, max_block_bytes=4 << 20)
    num_t = pl.cdiv(HW, T)

    # Pass 1: pooled spatial sums (N, C, 1) f32; no pad of x, tail masked.
    sums = pl.pallas_call(
        functools.partial(_pool_kernel, hw=HW, tile=T),
        out_shape=jax.ShapeDtypeStruct((N, C, 1), jnp.float32),
        grid_spec=pltpu.PrefetchScalarGridSpec(
            num_scalar_prefetch=0,
            grid=(N, num_t),
            in_specs=[pl.BlockSpec((None, C, T), lambda n, t: (n, 0, t))],
            out_specs=pl.BlockSpec((None, C, 1), lambda n, t: (n, 0, 0)),
        ),
        compiler_params=pltpu.CompilerParams(
            dimension_semantics=("parallel", "arbitrary"),
            vmem_limit_bytes=vmem_limit,
        ),
        cost_estimate=pl.CostEstimate(
            flops=2 * N * C * HW,
            transcendentals=0,
            bytes_accessed=N * C * HW * itemsize + N * C * 4,
        ),
    )(x_flat)

    # Pass 2: tiny squeeze/excite in plain JAX (no extra kernel launch; s is
    # emitted already in the activation dtype and shaped (N, C, 1)).
    pooled = sums[:, :, 0] * (1.0 / HW)                           # (N, C) f32
    h = jnp.maximum(pooled @ w1f.T + b1c[:, 0], 0.0)              # (N, Cr)
    s = jax.nn.sigmoid(h @ w2f.T + b2c[:, 0]).astype(dtype)       # (N, C)
    s = s.reshape(N, C, 1)

    # Pass 3: per-channel scale, lane-dense stores, no pad/slice of x or out.
    out_flat = pl.pallas_call(
        _scale_kernel,
        out_shape=jax.ShapeDtypeStruct((N, C, HW), dtype),
        grid_spec=pltpu.PrefetchScalarGridSpec(
            num_scalar_prefetch=0,
            grid=(N, num_t),
            in_specs=[
                pl.BlockSpec((None, C, T), lambda n, t: (n, 0, t)),
                pl.BlockSpec((None, C, 1), lambda n, t: (n, 0, 0)),
            ],
            out_specs=pl.BlockSpec((None, C, T), lambda n, t: (n, 0, t)),
        ),
        compiler_params=pltpu.CompilerParams(
            dimension_semantics=("parallel", "parallel"),
            vmem_limit_bytes=vmem_limit,
        ),
        cost_estimate=pl.CostEstimate(
            flops=N * C * HW,
            transcendentals=0,
            bytes_accessed=2 * N * C * HW * itemsize + N * C * itemsize,
        ),
    )(x_flat, s)
    return out_flat.reshape(N, C, H, W)


def _reference(x, w1, b1, w2, b2):
    # Pure-JAX reference of the PyTorch forward.
    pooled = jnp.mean(x, axis=(2, 3))                              # (N, C)
    h = jnp.maximum(pooled @ w1.T + b1, 0.0)                       # (N, Cr)
    s = jax.nn.sigmoid(h @ w2.T + b2)                              # (N, C)
    return x * s[:, :, None, None]


if __name__ == "__main__":
    # Small shapes consistent with the module: channels=4, reduction=2.
    N, C, H, W = 2, 4, 16, 16
    reduction = 2
    Cr = C // reduction

    key = jax.random.PRNGKey(0)
    kx, k1, kb1, k2, kb2 = jax.random.split(key, 5)

    x = jax.random.normal(kx, (N, C, H, W), dtype=jnp.float32)
    # Deterministic synthetic params (Conv2d 1x1 weights squeezed to 2-D).
    w1 = jax.random.normal(k1, (Cr, C), dtype=jnp.float32) * 0.5
    b1 = jax.random.normal(kb1, (Cr,), dtype=jnp.float32) * 0.1
    w2 = jax.random.normal(k2, (C, Cr), dtype=jnp.float32) * 0.5
    b2 = jax.random.normal(kb2, (C,), dtype=jnp.float32) * 0.1

    ref = _reference(x, w1, b1, w2, b2)

    # Primary fused path.
    out = jax.block_until_ready(se_module(x, w1, b1, w2, b2))
    assert out.shape == (N, C, H, W)
    assert jnp.allclose(out, ref, atol=1e-5, rtol=1e-5)

    # Also exercise the streaming fallback path once at the same small shape.
    out_mp = jax.block_until_ready(
        se_module(x, w1, b1, w2, b2, force_multi_pass=True))
    assert jnp.allclose(out_mp, ref, atol=1e-5, rtol=1e-5)

    print("KERNEL_OK")
</pallas_src>

<mosaic_0001>
module attributes {stable_mosaic.version = 11 : i64} {
  func.func @_fused_kernel(%arg0: i32, %arg1: memref<2x4x256xf32, #tpu.memory_space<vmem>>, %arg2: memref<2x4xf32, #tpu.memory_space<vmem>>, %arg3: memref<2x1xf32, #tpu.memory_space<vmem>>, %arg4: memref<4x2xf32, #tpu.memory_space<vmem>>, %arg5: memref<4x1xf32, #tpu.memory_space<vmem>>, %arg6: memref<2x4x256xf32, #tpu.memory_space<vmem>>) attributes {dimension_semantics = [#tpu.dimension_semantics<parallel>], iteration_bounds = array<i64: 1>, scalar_prefetch = 0 : i64, scratch_operands = 0 : i64, tpu.core_type = #tpu.core_type<tc>, window_params = [{transform_indices = @transform_0, window_bounds = array<i64: 2, 4, 256>}, {pipeline_mode = #tpu.pipeline_mode<synchronous>, transform_indices = @transform_1, window_bounds = array<i64: 2, 4>}, {pipeline_mode = #tpu.pipeline_mode<synchronous>, transform_indices = @transform_2, window_bounds = array<i64: 2, 1>}, {pipeline_mode = #tpu.pipeline_mode<synchronous>, transform_indices = @transform_3, window_bounds = array<i64: 4, 2>}, {pipeline_mode = #tpu.pipeline_mode<synchronous>, transform_indices = @transform_4, window_bounds = array<i64: 4, 1>}, {transform_indices = @transform_5, window_bounds = array<i64: 2, 4, 256>}]} {
    %cst = arith.constant 1.000000e+00 : f32
    %0 = vector.broadcast %cst : f32 to vector<256x1xf32>
    %c0 = arith.constant 0 : index
    %c0_0 = arith.constant 0 : index
    %1 = vector.load %arg2[%c0, %c0_0] : memref<2x4xf32, #tpu.memory_space<vmem>>, vector<2x4xf32>
    %c0_1 = arith.constant 0 : index
    %c0_2 = arith.constant 0 : index
    %2 = vector.load %arg3[%c0_1, %c0_2] : memref<2x1xf32, #tpu.memory_space<vmem>>, vector<2x1xf32>
    %c0_3 = arith.constant 0 : index
    %c0_4 = arith.constant 0 : index
    %3 = vector.load %arg4[%c0_3, %c0_4] : memref<4x2xf32, #tpu.memory_space<vmem>>, vector<4x2xf32>
    %c0_5 = arith.constant 0 : index
    %c0_6 = arith.constant 0 : index
    %4 = vector.load %arg5[%c0_5, %c0_6] : memref<4x1xf32, #tpu.memory_space<vmem>>, vector<4x1xf32>
    %c0_7 = arith.constant 0 : index
    %c0_8 = arith.constant 0 : index
    %c0_9 = arith.constant 0 : index
    %5 = vector.load %arg1[%c0_7, %c0_8, %c0_9] : memref<2x4x256xf32, #tpu.memory_space<vmem>>, vector<1x4x256xf32>
    %6 = vector.shape_cast %5 : vector<1x4x256xf32> to vector<4x256xf32>
    %cst_10 = arith.constant dense<0.000000e+00> : vector<4x1xf32>
    %7 = tpu.matmul %6, %0, %cst_10 {dimension_numbers = #tpu.dot_dimension_numbers<[1], [0], [0], [1], [0, 0, 1, 1], [], []>} : vector<4x256xf32>, vector<256x1xf32>, vector<4x1xf32> -> vector<4x1xf32>
    %cst_11 = arith.constant 3.906250e-03 : f32
    %8 = vector.broadcast %cst_11 : f32 to vector<4x1xf32>
    %9 = arith.mulf %7, %8 : vector<4x1xf32>
    %cst_12 = arith.constant dense<0.000000e+00> : vector<2x1xf32>
    %10 = tpu.matmul %1, %9, %cst_12 {dimension_numbers = #tpu.dot_dimension_numbers<[1], [0], [0], [1], [0, 0, 1, 1], [], []>} : vector<2x4xf32>, vector<4x1xf32>, vector<2x1xf32> -> vector<2x1xf32>
    %11 = arith.addf %10, %2 : vector<2x1xf32>
    %cst_13 = arith.constant 0.000000e+00 : f32
    %12 = vector.broadcast %cst_13 : f32 to vector<2x1xf32>
    %13 = arith.maximumf %11, %12 : vector<2x1xf32>
    %cst_14 = arith.constant dense<0.000000e+00> : vector<4x1xf32>
    %14 = tpu.matmul %3, %13, %cst_14 {dimension_numbers = #tpu.dot_dimension_numbers<[1], [0], [0], [1], [0, 0, 1, 1], [], []>} : vector<4x2xf32>, vector<2x1xf32>, vector<4x1xf32> -> vector<4x1xf32>
    %15 = arith.addf %14, %4 : vector<4x1xf32>
    %16 = arith.negf %15 : vector<4x1xf32>
    %17 = math.exp %16 : vector<4x1xf32>
    %cst_15 = arith.constant 1.000000e+00 : f32
    %18 = vector.broadcast %cst_15 : f32 to vector<4x1xf32>
    %19 = arith.addf %18, %17 : vector<4x1xf32>
    %20 = arith.divf %18, %19 : vector<4x1xf32>
    %21 = vector.broadcast %20 : vector<4x1xf32> to vector<4x256xf32>
    %22 = arith.mulf %6, %21 : vector<4x256xf32>
    %c0_16 = arith.constant 0 : index
    %c0_17 = arith.constant 0 : index
    %c0_18 = arith.constant 0 : index
    %23 = vector.load %arg6[%c0_16, %c0_17, %c0_18] : memref<2x4x256xf32, #tpu.memory_space<vmem>>, vector<1x4x256xf32>
    %24 = vector.shape_cast %23 : vector<1x4x256xf32> to vector<4x256xf32>
    %25 = vector.shape_cast %22 : vector<4x256xf32> to vector<1x4x256xf32>
    tpu.vector_store %arg6[%c0_16, %c0_17, %c0_18], %25 {strides = array<i32>} : memref<2x4x256xf32, #tpu.memory_space<vmem>>, vector<1x4x256xf32>,
    %c1 = arith.constant 1 : index
    %c0_19 = arith.constant 0 : index
    %c0_20 = arith.constant 0 : index
    %26 = vector.load %arg1[%c1, %c0_19, %c0_20] : memref<2x4x256xf32, #tpu.memory_space<vmem>>, vector<1x4x256xf32>
    %27 = vector.shape_cast %26 : vector<1x4x256xf32> to vector<4x256xf32>
    %cst_21 = arith.constant dense<0.000000e+00> : vector<4x1xf32>
    %28 = tpu.matmul %27, %0, %cst_21 {dimension_numbers = #tpu.dot_dimension_numbers<[1], [0], [0], [1], [0, 0, 1, 1], [], []>} : vector<4x256xf32>, vector<256x1xf32>, vector<4x1xf32> -> vector<4x1xf32>
    %cst_22 = arith.constant 3.906250e-03 : f32
    %29 = vector.broadcast %cst_22 : f32 to vector<4x1xf32>
    %30 = arith.mulf %28, %29 : vector<4x1xf32>
    %cst_23 = arith.constant dense<0.000000e+00> : vector<2x1xf32>
    %31 = tpu.matmul %1, %30, %cst_23 {dimension_numbers = #tpu.dot_dimension_numbers<[1], [0], [0], [1], [0, 0, 1, 1], [], []>} : vector<2x4xf32>, vector<4x1xf32>, vector<2x1xf32> -> vector<2x1xf32>
    %32 = arith.addf %31, %2 : vector<2x1xf32>
    %cst_24 = arith.constant 0.000000e+00 : f32
    %33 = vector.broadcast %cst_24 : f32 to vector<2x1xf32>
    %34 = arith.maximumf %32, %33 : vector<2x1xf32>
    %cst_25 = arith.constant dense<0.000000e+00> : vector<4x1xf32>
    %35 = tpu.matmul %3, %34, %cst_25 {dimension_numbers = #tpu.dot_dimension_numbers<[1], [0], [0], [1], [0, 0, 1, 1], [], []>} : vector<4x2xf32>, vector<2x1xf32>, vector<4x1xf32> -> vector<4x1xf32>
    %36 = arith.addf %35, %4 : vector<4x1xf32>
    %37 = arith.negf %36 : vector<4x1xf32>
    %38 = math.exp %37 : vector<4x1xf32>
    %cst_26 = arith.constant 1.000000e+00 : f32
    %39 = vector.broadcast %cst_26 : f32 to vector<4x1xf32>
    %40 = arith.addf %39, %38 : vector<4x1xf32>
    %41 = arith.divf %39, %40 : vector<4x1xf32>
    %42 = vector.broadcast %41 : vector<4x1xf32> to vector<4x256xf32>
    %43 = arith.mulf %27, %42 : vector<4x256xf32>
    %c1_27 = arith.constant 1 : index
    %c0_28 = arith.constant 0 : index
    %c0_29 = arith.constant 0 : index
    %44 = vector.load %arg6[%c1_27, %c0_28, %c0_29] : memref<2x4x256xf32, #tpu.memory_space<vmem>>, vector<1x4x256xf32>
    %45 = vector.shape_cast %44 : vector<1x4x256xf32> to vector<4x256xf32>
    %46 = vector.shape_cast %43 : vector<4x256xf32> to vector<1x4x256xf32>
    tpu.vector_store %arg6[%c1_27, %c0_28, %c0_29], %46 {strides = array<i32>} : memref<2x4x256xf32, #tpu.memory_space<vmem>>, vector<1x4x256xf32>,
    return
  }
  func.func @transform_0(%arg0: i32) -> (i32, i32, i32) {
    %c0_i32 = arith.constant 0 : i32
    %c0_i32_0 = arith.constant 0 : i32
    %c0_i32_1 = arith.constant 0 : i32
    return %arg0, %c0_i32, %c0_i32_0 : i32, i32, i32
  }
  func.func @transform_1(%arg0: i32) -> (i32, i32) {
    %c0_i32 = arith.constant 0 : i32
    %c0_i32_0 = arith.constant 0 : i32
    %c0_i32_1 = arith.constant 0 : i32
    return %c0_i32, %c0_i32_0 : i32, i32
  }
  func.func @transform_2(%arg0: i32) -> (i32, i32) {
    %c0_i32 = arith.constant 0 : i32
    %c0_i32_0 = arith.constant 0 : i32
    %c0_i32_1 = arith.constant 0 : i32
    return %c0_i32, %c0_i32_0 : i32, i32
  }
  func.func @transform_3(%arg0: i32) -> (i32, i32) {
    %c0_i32 = arith.constant 0 : i32
    %c0_i32_0 = arith.constant 0 : i32
    %c0_i32_1 = arith.constant 0 : i32
    return %c0_i32, %c0_i32_0 : i32, i32
  }
  func.func @transform_4(%arg0: i32) -> (i32, i32) {
    %c0_i32 = arith.constant 0 : i32
    %c0_i32_0 = arith.constant 0 : i32
    %c0_i32_1 = arith.constant 0 : i32
    return %c0_i32, %c0_i32_0 : i32, i32
  }
  func.func @transform_5(%arg0: i32) -> (i32, i32, i32) {
    %c0_i32 = arith.constant 0 : i32
    %c0_i32_0 = arith.constant 0 : i32
    %c0_i32_1 = arith.constant 0 : i32
    return %arg0, %c0_i32, %c0_i32_0 : i32, i32, i32
  }
}

</mosaic_0001>

<bundles_post_ra>
// kernel: tpu_custom_call.1
= control target key start
LH: loop header
LB: loop body
LE: loop exit
PB: predicated region body
PF: predicated region fallthrough
CT: control target
= control target key end

     0   :  { %10 = vsyncpa [#allocation3], 0  ;;  %s905_s0 = inlined_call_operand.hbm [shape: f32[2,4,256], index: 0, kind: input, shape index: {}]   ;;  %s906_s1 = inlined_call_operand.vmem [shape: f32[2,4], index: 1, kind: input, shape index: {}]   ;;  %s907_s2 = inlined_call_operand.vmem [shape: f32[2,1], index: 2, kind: input, shape index: {}]   ;;  %s908_s3 = inlined_call_operand.vmem [shape: f32[4,2], index: 3, kind: input, shape index: {}]   ;;  %s909_s4 = inlined_call_operand.vmem [shape: f32[4,1], index: 4, kind: input, shape index: {}]   ;;  %s910_s5 = inlined_call_operand.hbm [shape: f32[2,4,256], index: 5, kind: output, shape index: {}]  }
   0x1   :  { %11 = vsyncpa [#allocation4], 0  ;;  %s760_s18 = smov [#allocation2]   ;;  %s712_s22 = scalar_lea.hbm %s905_s0, 256 }
   0x2   :  { %s17_s19 = sshll.u32 %s760_s18, 4  ;;  %p713_p0 = scmp.ne.s32.totalorder %s905_s0, %s712_s22  ;;  %s18_s19 = int_to_ptr.vmem [resolvable:$true] %s17_s19 }
   0x3   :  { %p716_p1 = scmp.lt.u32.totalorder %s712_s22, %s905_s0 }
   0x5   :  { %p718_p2 = pnand %p716_p1, %p713_p0 }
   0x7   :  { %721 = shalt.err (!%p718_p2)
}
   0x8   :  { %s722_s27 = scalar_lea.vmem %s18_s19, 256  ;;  %p727_p4 = scmp.lt.s32.totalorder %s18_s19, %s18_s19 }
   0x9   :  { %p723_p3 = scmp.ne.s32.totalorder %s18_s19, %s722_s27  ;;  %p728_p5 = scmp.lt.s32.totalorder %s722_s27, %s722_s27 }
   0xb   :  { %p729_p6 = por %p728_p5, %p727_p4 }
   0xd   :  { %p730_p7 = pnand %p729_p6, %p723_p3 }
   0xf   :  { %733 = shalt.err (!%p730_p7)
}
  0x10   :  { %s761_s28 = smov 128   ;;  %s762_s29 = smov 8  }
  0x11   :  { %23 = dma.hbm_to_vmem [thread:$0]  %s905_s0, 256, %s18_s19, [#allocation3], %s761_s28, %s761_s28, %s762_s29  }
  0x12   :  { %756 = dma.done.wait [#allocation3], 256  }
  0x13   :  { %757 = vsyncadd [#allocation3], 4294967040  ;;  %v763_v0 = vmov 1.0|1.0   ;;  %v819_v1 = vld [vmem:[#allocation2] sm:$0xff]  ;;  %v764_v3 = vmov 0.0   ;;  %v284_v32 = vlaneseq }
  0x14   :  { %660 = vmatprep.subr.bf16.mxu0 %v763_v0  ;;  %v41_v2 = vcombine.high %v819_v1, %v819_v1  ;;  %640 = vmatprep.subr.mxu1 %v764_v3  ;;  %vm765_vm0 = vmmov 0   ;;  %vm118_vm1 = vcmask 1043456   ;;  %v35_v8 = vld [vmem:[%s906_s1] sm:$0x3]  ;;  %vm114_vm2 = vcmask 31744   ;;  %v852_v11 = vld [vmem:[#allocation2 + $0x8] sm:$0xff] }
  0x15   :  { %661 = vmatpush3.bf16.msra.mxu0 %v763_v0  ;;  %642 = vmatprep.mubr.msk.f32.mxu1 %vm765_vm0, %v764_v3  ;;  %v36_v9 = vld [vmem:[%s907_s2] sm:$0x3]  ;;  %vm197_vm3 = vcmask 1041408   ;;  %vm193_vm4 = vcmask 15360   ;;  %v294_v16 = vcombine.high %v852_v11, %v852_v11  ;;  %v766_v17 = vmov 0  }
  0x16   :  { %662 = vmatprep.subr.bf16.mxu0 %v763_v0  ;;  %107 = vmatprep.mubr.f32.mxu0 %v41_v2  ;;  %v37_v15 = vld [vmem:[%s908_s3] sm:$0xf]  ;;  %v767_v30 = vmov 839922192   ;;  %v285_v34 = vshrl.u32 %v284_v32, 7 }
  0x17   :  { %701 = vset.pattern.permute.xlu0 %v766_v17  ;;  %v38_v18 = vld [vmem:[%s909_s4] sm:$0xf]  ;;  %v282_v31 = vunpack.c.l.s4 %v767_v30  ;;  %s768_s4 = smov [#allocation5]  }
  0x18   :  { %s540_s11 = sshll.u32 %s768_s4, 4  ;;  %s541_s11 = int_to_ptr.vmem [resolvable:$true] %s540_s11 }
  0x19   :  { %663 = vmatpush3.bf16.msra.mxu0 %v763_v0  ;;  %v283_v33 = vunpack.c.0.s8 %v282_v31  ;;  %s734_s12 = scalar_lea.vmem %s541_s11, 256  ;;  %p739_p9 = scmp.lt.s32.totalorder %s541_s11, %s541_s11 }
  0x1a   :  { %664 = vmatprep.subr.bf16.mxu0 %v763_v0  ;;  %p735_p8 = scmp.ne.s32.totalorder %s541_s11, %s734_s12  ;;  %p740_p10 = scmp.lt.s32.totalorder %s734_s12, %s734_s12 }
  0x1b   :  { %v286_v35 = vsub.s32 %v283_v33, %v285_v34 }
  0x1c   :  { %p741_p11 = por %p740_p10, %p739_p9 }
  0x1d   :  { %665 = vmatpush3.bf16.msra.mxu0 %v763_v0 }
  0x1e   :  { %666 = vmatprep.subr.bf16.mxu0 %v763_v0  ;;  %p742_p12 = pnand %p741_p11, %p735_p8 }
  0x21   :  { %667 = vmatpush3.bf16.msra.mxu0 %v763_v0 }
  0x22   :  { %668 = vmatprep.subr.bf16.mxu0 %v763_v0 }
  0x25   :  { %669 = vmatpush3.bf16.msra.mxu0 %v763_v0 }
  0x26   :  { %670 = vmatprep.subr.bf16.mxu0 %v763_v0 }
  0x29   :  { %671 = vmatpush3.bf16.msra.mxu0 %v763_v0 }
  0x2a   :  { %672 = vmatprep.subr.bf16.mxu0 %v763_v0 }
  0x2d   :  { %673 = vmatpush3.bf16.msra.mxu0 %v763_v0 }
  0x2e   :  { %674 = vmatprep.subr.bf16.mxu0 %v763_v0 }
  0x31   :  { %675 = vmatpush3.bf16.msra.mxu0 %v763_v0 }
  0x32   :  { %650 = vmatprep.subr.mxu0 %v764_v3 }
  0x34   :  { %108 = vmatmul.mubr.f32.vlgmr.msra.gmra.mrb[0].mxu0 %v819_v1 }
  0x35   :  { %652 = vmatprep.mubr.msk.f32.mxu0 %vm765_vm0, %v764_v3 }
 0x107   :  { %v594_v4 = vpop.f32.mrb[0].mxu0 }
 0x108   :  { %v595_v5 = vpop.f32.mrb[1].mxu0 }
 0x109   :  { %v596_v6 = vadd.f32 %v595_v5, %v594_v4 }
 0x10b   :  { %v113_v7 = vmul.f32 0.00390625, %v596_v6 }
 0x10d   :  { %641 = vmatpush3.msk.msra.mxu1 %vm118_vm1, %v113_v7 }
 0x10e   :  { %643 = vmatmul.mubr.msk.f32.vlgmr.msra.gmra.mrb[0].mxu1 %vm114_vm2, %v35_v8  ;;  %645 = vmatprep.subr.mxu1 %v764_v3 }
 0x10f   :  { %647 = vmatprep.mubr.msk.f32.mxu1 %vm765_vm0, %v764_v3 }
 0x1e1   :  { %v188_v10 = vpop.f32.mrb[0].mxu1 }
 0x1e2   :  { %v189_v12 = vadd.f32 %v188_v10, %v36_v9  ;;  %v644_v13 = vpop.f32.mrb[1].mxu1 }
 0x1e4   :  { %v192_v14 = vmax.f32 %v189_v12, 0.0 }
 0x1e6   :  { %646 = vmatpush3.msk.msra.mxu1 %vm197_vm3, %v192_v14 }
 0x1e7   :  { %648 = vmatmul.mubr.msk.f32.vlgmr.msra.gmra.mrb[2].mxu1 %vm193_vm4, %v37_v15  ;;  %676 = vmatprep.subr.bf16.mxu1 %v763_v0 }
 0x1e8   :  { %677 = vmatpush3.bf16.msra.mxu1 %v763_v0  ;;  %360 = vmatprep.mubr.f32.mxu1 %v294_v16 }
 0x1e9   :  { %678 = vmatprep.subr.bf16.mxu1 %v763_v0 }
 0x1ec   :  { %679 = vmatpush3.bf16.msra.mxu1 %v763_v0 }
 0x1ed   :  { %680 = vmatprep.subr.bf16.mxu1 %v763_v0 }
 0x1f0   :  { %681 = vmatpush3.bf16.msra.mxu1 %v763_v0 }
 0x1f1   :  { %682 = vmatprep.subr.bf16.mxu1 %v763_v0 }
 0x1f4   :  { %683 = vmatpush3.bf16.msra.mxu1 %v763_v0 }
 0x1f5   :  { %684 = vmatprep.subr.bf16.mxu1 %v763_v0 }
 0x1f8   :  { %685 = vmatpush3.bf16.msra.mxu1 %v763_v0 }
 0x1f9   :  { %686 = vmatprep.subr.bf16.mxu1 %v763_v0 }
 0x1fc   :  { %687 = vmatpush3.bf16.msra.mxu1 %v763_v0 }
 0x1fd   :  { %688 = vmatprep.subr.bf16.mxu1 %v763_v0 }
 0x200   :  { %689 = vmatpush3.bf16.msra.mxu1 %v763_v0 }
 0x201   :  { %690 = vmatprep.subr.bf16.mxu1 %v763_v0 }
 0x204   :  { %691 = vmatpush3.bf16.msra.mxu1 %v763_v0 }
 0x207   :  { %361 = vmatmul.mubr.f32.vlgmr.msra.gmra.mrb[4].mxu1 %v852_v11 }
 0x2ba   :  { %v267_v19 = vpop.f32.mrb[2].mxu1 }
 0x2bb   :  { %v268_v20 = vadd.f32 %v267_v19, %v38_v18  ;;  %v649_v21 = vpop.f32.mrb[3].mxu1 }
 0x2bd   :  { %v556_v22 = vmul.f32 -1.442695, %v268_v20 }
 0x2bf   :  { %704 = vpow2.f32 %v556_v22 }
 0x2c9   :  { %v705_v23 = vpop.eup %704 }
 0x2ca   :  { %v274_v24 = vadd.f32 1.0, %v705_v23 }
 0x2cc   :  { %706 = vrcp.f32 %v274_v24 }
 0x2d6   :  { %v707_v25 = vpop.eup %706 }
 0x2d7   :  { %279 = vperm.xlu0 %701, %v707_v25  }
 0x2da   :  { %v633_v26 = vpop.f32.mrb[4].mxu1 }
 0x2db   :  { %v634_v27 = vpop.f32.mrb[5].mxu1 }
 0x2dc   :  { %v635_v28 = vadd.f32 %v634_v27, %v633_v26 }
 0x2de   :  { %v366_v29 = vmul.f32 0.00390625, %v635_v28 }
 0x2e0   :  { %651 = vmatpush3.msk.msra.mxu0 %vm118_vm1, %v366_v29 }
 0x2e1   :  { %653 = vmatmul.mubr.msk.f32.vlgmr.msra.gmra.mrb[2].mxu0 %vm114_vm2, %v35_v8  ;;  %655 = vmatprep.subr.mxu0 %v764_v3 }
 0x2e2   :  { %657 = vmatprep.mubr.msk.f32.mxu0 %vm765_vm0, %v764_v3 }
 0x356   :  { %v280_v36 = vpop.permute.xlu0 %279 }
 0x357   :  { %v287_v37 = vrot.slane %v280_v36, %v286_v35 }
 0x359   :  { %v289_v38 = vmul.f32 %v287_v37, %v819_v1 }
 0x35b   :  { %290 = vst [vmem:[#allocation5] sm:$0xff] %v289_v38 }
 0x3b4   :  { %v436_v39 = vpop.f32.mrb[2].mxu0 }
 0x3b5   :  { %v437_v40 = vadd.f32 %v436_v39, %v36_v9  ;;  %v654_v41 = vpop.f32.mrb[3].mxu0 }
 0x3b7   :  { %v440_v42 = vmax.f32 %v437_v40, 0.0 }
 0x3b9   :  { %656 = vmatpush3.msk.msra.mxu0 %vm197_vm3, %v440_v42 }
 0x3ba   :  { %658 = vmatmul.mubr.msk.f32.vlgmr.msra.gmra.mrb[4].mxu0 %vm193_vm4, %v37_v15 }
 0x48d   :  { %v510_v43 = vpop.f32.mrb[4].mxu0 }
 0x48e   :  { %v511_v44 = vadd.f32 %v510_v43, %v38_v18  ;;  %v659_v45 = vpop.f32.mrb[5].mxu0 }
 0x490   :  { %v561_v46 = vmul.f32 -1.442695, %v511_v44 }
 0x492   :  { %708 = vpow2.f32 %v561_v46 }
 0x49c   :  { %v709_v47 = vpop.eup %708 }
 0x49d   :  { %v517_v48 = vadd.f32 1.0, %v709_v47 }
 0x49f   :  { %710 = vrcp.f32 %v517_v48 }
 0x4a9   :  { %v711_v49 = vpop.eup %710 }
 0x4aa   :  { %522 = vperm.xlu0 %701, %v711_v49  }
 0x529   :  { %v523_v50 = vpop.permute.xlu0 %522 }
 0x52a   :  { %v530_v51 = vrot.slane %v523_v50, %v286_v35 }
 0x52c   :  { %v532_v52 = vmul.f32 %v530_v51, %v852_v11 }
 0x52e   :  { %534 = vst [vmem:[#allocation5 + $0x8] sm:$0xff] %v532_v52 }
 0x52f   :  { %745 = shalt.err (!%p742_p12)
}
 0x530   :  { %s746_s15 = scalar_lea.hbm %s910_s5, 256 }
 0x531   :  { %p747_p13 = scmp.ne.s32.totalorder %s910_s5, %s746_s15  ;;  %p750_p0 = scmp.lt.u32.totalorder %s746_s15, %s910_s5 }
 0x533   :  { %p752_p1 = pnand %p750_p0, %p747_p13 }
 0x535   :  { %755 = shalt.err (!%p752_p1)
}
 0x536   :  { %546 = dma.vmem_to_hbm [thread:$0]  %s541_s11, 256, %s910_s5, [#allocation4], %s761_s28, %s761_s28, %s762_s29  }
 0x537   :  { %758 = dma.done.wait [#allocation4], 256  }
 0x538   :  { %759 = vsyncadd [#allocation4], 4294967040 }
 0x539   :  { %550 = vsyncpa [#allocation3], 1 }
 0x53a   :  { %551 = vsyncpa [#allocation4], 1 }

</bundles_post_ra>
